<compile_context>
chip_gen: v7x
topology: tpu7x:2x2x1
jax: 0.10.0
libtpu: 0.0.40
codegen_flags: <defaults>
</compile_context>

<pallas_src>
import functools
import math

import jax
import jax.numpy as jnp
from jax import lax
from jax.experimental import pallas as pl
from jax.experimental.pallas import tpu as pltpu

_LANE = 128
_SUBLANE = 8
_PAD_YY = 1e30   # padded-class ||mean||^2 sentinel -> yy_h = -5e29: never the
                 # row max, never matched by a real label.


def _round_up(x, m):
    return (x + m - 1) // m * m


def _cdiv(a, b):
    return -(-a // b)


def _vmem_capacity_bytes():
    """Generation-aware VMEM capacity (falls back to v7x's 64 MiB per core)."""
    try:
        info = pltpu.get_tpu_info()
        cap = int(getattr(info, "vmem_capacity_bytes", 0) or 0)
        if cap > 0:
            return cap
    except Exception:
        pass
    return 64 * 1024 * 1024


# --------------------------------------------------------------------------- #
# Kernels
# --------------------------------------------------------------------------- #
def _lgm_labeled_kernel(feat_ref, means_ref, yyh_ref, labels_ref,
                        logits_ref, part_ref, *, alpha, lambda_, batch_size, tile_c):
    """One (batch tile, class tile) step of the labeled branch."""
    j = pl.program_id(1)

    feat = feat_ref[...]                                          # (TB, D) native dtype
    # MXU: means already in (D, TC) weight layout -> contract K on sublanes.
    xy = lax.dot_general(feat, means_ref[...], (((1,), (0,)), ((), ())),
                         preferred_element_type=jnp.float32)      # (TB, TC)
    f32 = feat.astype(jnp.float32)
    xx_h = -0.5 * jnp.sum(f32 * f32, axis=1, keepdims=True)       # (TB, 1)
    neg = xy + xx_h + yyh_ref[...]                                # (TB, TC): 2 wide adds

    tb, tc = logits_ref.shape
    labels = labels_ref[...]                                      # (TB, 1) int32, -1 pads
    cls = j * tile_c + lax.broadcasted_iota(jnp.int32, (tb, tc), 1)
    neg_sel = jnp.where(cls == labels, neg, 0.0)                  # single select, reused
    logits_ref[...] = (neg + alpha * neg_sel).astype(logits_ref.dtype)

    # sum_i ||feat_i - means[label_i]||^2 == -2 * sum(selected neg)   (exact)
    part = (-lambda_ / batch_size) * jnp.sum(neg_sel)
    part_ref[...] = jnp.broadcast_to(part, part_ref.shape).astype(jnp.float32)


def _lgm_unlabeled_kernel(feat_ref, means_ref, yyh_ref,
                          neg_ref, part_ref, m_sc, *, lambda_, batch_size, tile_b):
    """One (batch tile, class tile) step of the pseudo-label branch."""
    i = pl.program_id(0)
    j = pl.program_id(1)
    n_c = pl.num_programs(1)

    @pl.when(j == 0)
    def _():
        m_sc[...] = jnp.full(m_sc.shape, -jnp.inf, dtype=m_sc.dtype)

    feat = feat_ref[...]
    xy = lax.dot_general(feat, means_ref[...], (((1,), (0,)), ((), ())),
                         preferred_element_type=jnp.float32)
    f32 = feat.astype(jnp.float32)
    xx_h = -0.5 * jnp.sum(f32 * f32, axis=1, keepdims=True)
    neg = xy + xx_h + yyh_ref[...]
    neg_ref[...] = neg.astype(neg_ref.dtype)

    # running per-row max across class tiles (argmax-free exact identity)
    m_sc[...] = jnp.maximum(m_sc[...], jnp.max(neg, axis=1, keepdims=True))

    @pl.when(j == n_c - 1)
    def _():
        tb = m_sc.shape[0]
        row = i * tile_b + lax.broadcasted_iota(jnp.int32, (tb, 1), 0)
        rmax = jnp.where(row < batch_size, m_sc[...], 0.0)        # mask padded rows
        # ||feat_i - means[argmax_c neg]||^2 == -2 * max_c neg     (exact)
        part = (-lambda_ / batch_size) * jnp.sum(rmax)
        part_ref[...] = jnp.broadcast_to(part, part_ref.shape).astype(jnp.float32)


# --------------------------------------------------------------------------- #
# Tiling / VMEM plan
# --------------------------------------------------------------------------- #
def _plan(B, D_pad, C, itemsize):
    """Pick (TB, TC, C_pad, vmem_limit) from the actual chip's VMEM capacity."""
    cap = _vmem_capacity_bytes()
    budget = cap * 3 // 4                      # ~48 MiB on v7x, ~96 MiB on v5e/v6e
    b_cap = max(_SUBLANE, _round_up(B, _SUBLANE))
    c_pad0 = _round_up(C, _LANE)

    def max_tb(tc, n_c):
        means_buf = 1 if n_c == 1 else 2       # resident means -> single buffer
        fixed = means_buf * tc * (D_pad * itemsize + 4)          # means + yy_h tiles
        fixed += 4 * _SUBLANE * _LANE * 4 + (1 << 16)            # partial bufs + slack
        per_row = 2 * (D_pad + tc) * itemsize + 16               # feat in + out (+labels, m_sc)
        avail = budget - fixed
        if avail <= 0:
            return 0
        return int(min((avail // per_row) // _SUBLANE * _SUBLANE, 1024, b_cap))

    tc = c_pad0
    target_tb = min(256, b_cap)
    while True:
        tb = max_tb(tc, _cdiv(c_pad0, tc))
        if tb >= target_tb or tc <= _LANE:
            break
        tc = _round_up(max(_LANE, tc // 2), _LANE)   # stream the class axis
    tb = max(tb, _SUBLANE)
    if b_cap > _SUBLANE:                              # v7x megacore: >= 2 batch tiles
        tb = min(tb, _round_up(_cdiv(B, 2), _SUBLANE))

    c_pad = _round_up(c_pad0, tc)
    n_c = c_pad // tc
    means_buf = 1 if n_c == 1 else 2
    need = (means_buf * tc * (D_pad * itemsize + 4)
            + 2 * tb * (D_pad + tc) * itemsize
            + 3 * tb * 4 + 4 * _SUBLANE * _LANE * 4)
    vmem_limit = int(min(max(need + (4 << 20), 32 << 20), cap * 9 // 10))
    return tb, tc, c_pad, vmem_limit


def _spec(shape, index_map, single_buffer=False):
    if single_buffer:
        return pl.BlockSpec(shape, index_map, pipeline_mode=pl.Buffered(1))
    return pl.BlockSpec(shape, index_map)


# --------------------------------------------------------------------------- #
# Wrapper
# --------------------------------------------------------------------------- #
def lgm_loss_forward(feat, means, labels=None, *, alpha=0.1, lambda_=0.01):
    """Pallas implementation of LGMLoss_.forward.

    labels is None  -> (neg_sqr_dist, likelihood_reg_loss, means)
    labels provided -> (means, logits_with_margin, likelihood_reg_loss)
    """
    B, D = feat.shape
    C, Dm = means.shape
    assert D == Dm

    cdt = jnp.promote_types(feat.dtype, means.dtype)
    itemsize = jnp.dtype(cdt).itemsize
    d_mult = _SUBLANE * max(1, 4 // itemsize)        # 8 f32 / 16 bf16 / 32 int8
    D_pad = _round_up(D, d_mult)

    TB, TC, C_pad, vmem_limit = _plan(B, D_pad, C, itemsize)
    B_pad = _round_up(B, TB)
    nb, nc = B_pad // TB, C_pad // TC
    resident = nc == 1

    feat_p = feat.astype(cdt)
    if (B_pad, D_pad) != (B, D):
        feat_p = jnp.pad(feat_p, ((0, B_pad - B), (0, D_pad - D)))
    means_p = means.astype(cdt)
    if (C_pad, D_pad) != (C, D):
        means_p = jnp.pad(means_p, ((0, C_pad - C), (0, D_pad - D)))
    means_t = means_p.T                              # (D_pad, C_pad): MXU weight layout

    # yy_h = -0.5 * ||mean_c||^2, hoisted out of the grid; padded classes -> -5e29.
    yy_h = -0.5 * jnp.sum(means.astype(jnp.float32) ** 2, axis=1)
    if C_pad != C:
        yy_h = jnp.concatenate(
            [yy_h, jnp.full((C_pad - C,), -0.5 * _PAD_YY, jnp.float32)])
    yy_h = yy_h.reshape(1, C_pad)

    feat_spec = _spec((TB, D_pad), lambda i, j: (i, 0))
    means_spec = _spec((D_pad, TC), lambda i, j: (0, j), resident)
    yyh_spec = _spec((1, TC), lambda i, j: (0, j), resident)
    out_main_spec = _spec((TB, TC), lambda i, j: (i, j))

    if labels is None:
        kernel = functools.partial(_lgm_unlabeled_kernel, lambda_=float(lambda_),
                                   batch_size=B, tile_b=TB)
        neg_p, partials = pl.pallas_call(
            kernel,
            out_shape=(jax.ShapeDtypeStruct((B_pad, C_pad), cdt),
                       jax.ShapeDtypeStruct((nb, _SUBLANE, _LANE), jnp.float32)),
            grid=(nb, nc),
            in_specs=[feat_spec, means_spec, yyh_spec],
            out_specs=(out_main_spec,
                       _spec((1, _SUBLANE, _LANE), lambda i, j: (i, 0, 0))),
            scratch_shapes=[pltpu.VMEM((TB, 1), jnp.float32)],
            compiler_params=pltpu.CompilerParams(
                dimension_semantics=("parallel", "arbitrary"),
                vmem_limit_bytes=vmem_limit),
        )(feat_p, means_t, yy_h)
        reg = jnp.sum(partials[:, 0, 0])
        return neg_p[:B, :C], reg, means

    labels2d = labels.reshape(B, 1).astype(jnp.int32)
    if B_pad != B:
        labels2d = jnp.pad(labels2d, ((0, B_pad - B), (0, 0)), constant_values=-1)

    kernel = functools.partial(_lgm_labeled_kernel, alpha=float(alpha),
                               lambda_=float(lambda_), batch_size=B, tile_c=TC)
    logits_p, partials = pl.pallas_call(
        kernel,
        out_shape=(jax.ShapeDtypeStruct((B_pad, C_pad), cdt),
                   jax.ShapeDtypeStruct((nb, nc, _SUBLANE, _LANE), jnp.float32)),
        grid=(nb, nc),
        in_specs=[feat_spec, means_spec, yyh_spec,
                  _spec((TB, 1), lambda i, j: (i, 0))],
        out_specs=(out_main_spec,
                   _spec((1, 1, _SUBLANE, _LANE), lambda i, j: (i, j, 0, 0))),
        compiler_params=pltpu.CompilerParams(
            dimension_semantics=("parallel", "parallel"),
            vmem_limit_bytes=vmem_limit),
    )(feat_p, means_t, yy_h, labels2d)
    reg = jnp.sum(partials[:, :, 0, 0])
    return means, logits_p[:B, :C], reg


# --------------------------------------------------------------------------- #
# Pure-JAX reference (mirrors the PyTorch module exactly)
# --------------------------------------------------------------------------- #
def _reference_forward(feat, means, labels=None, *, alpha=0.1, lambda_=0.01):
    B = feat.shape[0]
    C = means.shape[0]
    XY = feat @ means.T
    XX = jnp.sum(feat ** 2, axis=1, keepdims=True)
    YY = jnp.sum(means.T ** 2, axis=0, keepdims=True)
    neg = -0.5 * (XX - 2.0 * XY + YY)
    if labels is None:
        pseudo = jnp.argmax(neg, axis=1)
        mb = means[pseudo]
        reg = lambda_ * (jnp.sum((feat - mb) ** 2) / 2) * (1.0 / B)
        return neg, reg, means
    onehot = jax.nn.one_hot(labels, C, dtype=feat.dtype)
    K = 1.0 + alpha * onehot
    logits = neg * K
    mb = means[labels]
    reg = lambda_ * (jnp.sum((feat - mb) ** 2) / 2) * (1.0 / B)
    return means, logits, reg


if __name__ == "__main__":
    def _check(batch, num_classes, feat_dim, key):
        alpha, lambda_ = 0.1, 0.01
        k_means, k_feat, k_lbl = jax.random.split(key, 3)

        # xavier_uniform_ with gain=sqrt(2): bound = gain * sqrt(6 / (fan_in + fan_out))
        bound = math.sqrt(2.0) * math.sqrt(6.0 / (num_classes + feat_dim))
        means = jax.random.uniform(k_means, (num_classes, feat_dim),
                                   minval=-bound, maxval=bound, dtype=jnp.float32)
        feat = jax.random.normal(k_feat, (batch, feat_dim), dtype=jnp.float32)
        labels = jax.random.randint(k_lbl, (batch,), 0, num_classes, dtype=jnp.int32)

        # --- labeled branch ---
        m_out, logits, reg = lgm_loss_forward(feat, means, labels,
                                              alpha=alpha, lambda_=lambda_)
        jax.block_until_ready((m_out, logits, reg))
        _, logits_ref, reg_ref = _reference_forward(feat, means, labels,
                                                    alpha=alpha, lambda_=lambda_)
        assert jnp.allclose(logits, logits_ref, rtol=1e-5, atol=1e-4), "labeled logits mismatch"
        assert jnp.allclose(reg, reg_ref, rtol=1e-5, atol=1e-5), "labeled reg mismatch"

        # --- unlabeled (pseudo-label) branch ---
        neg, reg_u, _ = lgm_loss_forward(feat, means, None,
                                         alpha=alpha, lambda_=lambda_)
        jax.block_until_ready((neg, reg_u))
        neg_ref, reg_u_ref, _ = _reference_forward(feat, means, None,
                                                   alpha=alpha, lambda_=lambda_)
        assert jnp.allclose(neg, neg_ref, rtol=1e-5, atol=1e-4), "unlabeled neg mismatch"
        assert jnp.allclose(reg_u, reg_u_ref, rtol=1e-5, atol=1e-5), "unlabeled reg mismatch"

    root = jax.random.PRNGKey(0)
    k0, k1 = jax.random.split(root)
    _check(batch=8, num_classes=8, feat_dim=32, key=k0)
    _check(batch=20, num_classes=10, feat_dim=48, key=k1)  # padding + 2 batch tiles
    print("KERNEL_OK")
</pallas_src>

<mosaic_0001>
module attributes {stable_mosaic.version = 11 : i64} {
  func.func @_lgm_labeled_kernel(%arg0: i32, %arg1: i32, %arg2: memref<8x32xf32, #tpu.memory_space<vmem>>, %arg3: memref<32x128xf32, #tpu.memory_space<vmem>>, %arg4: memref<1x128xf32, #tpu.memory_space<vmem>>, %arg5: memref<8x1xi32, #tpu.memory_space<vmem>>, %arg6: memref<8x128xf32, #tpu.memory_space<vmem>>, %arg7: memref<1x1x8x128xf32, #tpu.memory_space<vmem>>) attributes {dimension_semantics = [#tpu.dimension_semantics<parallel>, #tpu.dimension_semantics<parallel>], iteration_bounds = array<i64: 1, 1>, scalar_prefetch = 0 : i64, scratch_operands = 0 : i64, tpu.core_type = #tpu.core_type<tc>, window_params = [{transform_indices = @transform_0, window_bounds = array<i64: 8, 32>}, {pipeline_mode = #tpu.pipeline_mode<synchronous>, transform_indices = @transform_1, window_bounds = array<i64: 32, 128>}, {pipeline_mode = #tpu.pipeline_mode<synchronous>, transform_indices = @transform_2, window_bounds = array<i64: 1, 128>}, {transform_indices = @transform_3, window_bounds = array<i64: 8, 1>}, {transform_indices = @transform_4, window_bounds = array<i64: 8, 128>}, {transform_indices = @transform_5, window_bounds = array<i64: 1, 1, 8, 128>}]} {
    %c0 = arith.constant 0 : index
    %c0_0 = arith.constant 0 : index
    %0 = vector.load %arg2[%c0, %c0_0] : memref<8x32xf32, #tpu.memory_space<vmem>>, vector<8x32xf32>
    %c0_1 = arith.constant 0 : index
    %c0_2 = arith.constant 0 : index
    %1 = vector.load %arg3[%c0_1, %c0_2] : memref<32x128xf32, #tpu.memory_space<vmem>>, vector<32x128xf32>
    %cst = arith.constant dense<0.000000e+00> : vector<8x128xf32>
    %2 = tpu.matmul %0, %1, %cst {dimension_numbers = #tpu.dot_dimension_numbers<[1], [0], [0], [1], [0, 0, 1, 1], [], []>} : vector<8x32xf32>, vector<32x128xf32>, vector<8x128xf32> -> vector<8x128xf32>
    %3 = arith.mulf %0, %0 : vector<8x32xf32>
    %cst_3 = arith.constant dense<0.000000e+00> : vector<8xf32>
    %4 = vector.multi_reduction <add>, %3, %cst_3 [1] : vector<8x32xf32> to vector<8xf32>
    %5 = vector.shape_cast %4 : vector<8xf32> to vector<8x1xf32>
    %cst_4 = arith.constant -5.000000e-01 : f32
    %6 = vector.broadcast %cst_4 : f32 to vector<8x1xf32>
    %7 = arith.mulf %6, %5 : vector<8x1xf32>
    %8 = vector.broadcast %7 : vector<8x1xf32> to vector<8x128xf32>
    %9 = arith.addf %2, %8 : vector<8x128xf32>
    %c0_5 = arith.constant 0 : index
    %c0_6 = arith.constant 0 : index
    %10 = vector.load %arg4[%c0_5, %c0_6] : memref<1x128xf32, #tpu.memory_space<vmem>>, vector<1x128xf32>
    %11 = vector.broadcast %10 : vector<1x128xf32> to vector<8x128xf32>
    %12 = arith.addf %9, %11 : vector<8x128xf32>
    %c0_7 = arith.constant 0 : index
    %c0_8 = arith.constant 0 : index
    %13 = vector.load %arg5[%c0_7, %c0_8] : memref<8x1xi32, #tpu.memory_space<vmem>>, vector<8x1xi32>
    %c128_i32 = arith.constant 128 : i32
    %14 = arith.muli %arg1, %c128_i32 : i32
    %15 = tpu.iota {dimensions = array<i32: 1>} : vector<8x128xi32>
    %16 = vector.broadcast %14 : i32 to vector<8x128xi32>
    %17 = arith.addi %16, %15 : vector<8x128xi32>
    %18 = vector.broadcast %13 : vector<8x1xi32> to vector<8x128xi32>
    %19 = arith.cmpi eq, %17, %18 : vector<8x128xi32>
    %cst_9 = arith.constant 0.000000e+00 : f32
    %20 = vector.broadcast %cst_9 : f32 to vector<8x128xf32>
    %21 = arith.select %19, %12, %20 : vector<8x128xi1>, vector<8x128xf32>
    %cst_10 = arith.constant 1.000000e-01 : f32
    %22 = vector.broadcast %cst_10 : f32 to vector<8x128xf32>
    %23 = arith.mulf %22, %21 : vector<8x128xf32>
    %24 = arith.addf %12, %23 : vector<8x128xf32>
    %c0_11 = arith.constant 0 : index
    %c0_12 = arith.constant 0 : index
    %25 = vector.load %arg6[%c0_11, %c0_12] : memref<8x128xf32, #tpu.memory_space<vmem>>, vector<8x128xf32>
    tpu.vector_store %arg6[%c0_11, %c0_12], %24 {strides = array<i32>} : memref<8x128xf32, #tpu.memory_space<vmem>>, vector<8x128xf32>,
    %26 = vector.shape_cast %21 : vector<8x128xf32> to vector<1x8x128xf32>
    %cst_13 = arith.constant dense<0.000000e+00> : vector<1xf32>
    %27 = vector.multi_reduction <add>, %26, %cst_13 [1, 2] : vector<1x8x128xf32> to vector<1xf32>
    %28 = vector.shape_cast %27 : vector<1xf32> to vector<1x1x1xf32>
    %29 = vector.extract %28[0, 0, 0] : f32 from vector<1x1x1xf32>
    %cst_14 = arith.constant -1.250000e-03 : f32
    %30 = arith.mulf %cst_14, %29 : f32
    %31 = vector.broadcast %30 : f32 to vector<1x1x8x128xf32>
    %c0_15 = arith.constant 0 : index
    %c0_16 = arith.constant 0 : index
    %c0_17 = arith.constant 0 : index
    %c0_18 = arith.constant 0 : index
    %32 = vector.load %arg7[%c0_15, %c0_16, %c0_17, %c0_18] : memref<1x1x8x128xf32, #tpu.memory_space<vmem>>, vector<1x1x8x128xf32>
    tpu.vector_store %arg7[%c0_15, %c0_16, %c0_17, %c0_18], %31 {strides = array<i32>} : memref<1x1x8x128xf32, #tpu.memory_space<vmem>>, vector<1x1x8x128xf32>,
    return
  }
  func.func @transform_0(%arg0: i32, %arg1: i32) -> (i32, i32) {
    %c0_i32 = arith.constant 0 : i32
    %c0_i32_0 = arith.constant 0 : i32
    return %arg0, %c0_i32 : i32, i32
  }
  func.func @transform_1(%arg0: i32, %arg1: i32) -> (i32, i32) {
    %c0_i32 = arith.constant 0 : i32
    %c0_i32_0 = arith.constant 0 : i32
    return %c0_i32, %arg1 : i32, i32
  }
  func.func @transform_2(%arg0: i32, %arg1: i32) -> (i32, i32) {
    %c0_i32 = arith.constant 0 : i32
    %c0_i32_0 = arith.constant 0 : i32
    return %c0_i32, %arg1 : i32, i32
  }
  func.func @transform_3(%arg0: i32, %arg1: i32) -> (i32, i32) {
    %c0_i32 = arith.constant 0 : i32
    %c0_i32_0 = arith.constant 0 : i32
    return %arg0, %c0_i32 : i32, i32
  }
  func.func @transform_4(%arg0: i32, %arg1: i32) -> (i32, i32) {
    %c0_i32 = arith.constant 0 : i32
    return %arg0, %arg1 : i32, i32
  }
  func.func @transform_5(%arg0: i32, %arg1: i32) -> (i32, i32, i32, i32) {
    %c0_i32 = arith.constant 0 : i32
    %c0_i32_0 = arith.constant 0 : i32
    %c0_i32_1 = arith.constant 0 : i32
    return %arg0, %arg1, %c0_i32, %c0_i32_0 : i32, i32, i32, i32
  }
}

</mosaic_0001>

<bundles_post_ra>
// kernel: tpu_custom_call.1
= control target key start
LH: loop header
LB: loop body
LE: loop exit
PB: predicated region body
PF: predicated region fallthrough
CT: control target
= control target key end

     0   :  { %11 = vsyncpa [#allocation3], 0  ;;  %s374_s0 = inlined_call_operand.vmem [shape: f32[8,32], index: 0, kind: input, shape index: {}]   ;;  %s375_s1 = inlined_call_operand.hbm [shape: f32[32,128], index: 1, kind: input, shape index: {}]   ;;  %s376_s2 = inlined_call_operand.vmem [shape: f32[1,128], index: 2, kind: input, shape index: {}]   ;;  %s377_s3 = inlined_call_operand.vmem [shape: s32[8,1], index: 3, kind: input, shape index: {}]   ;;  %s378_s4 = inlined_call_operand.hbm [shape: f32[8,128], index: 4, kind: output, shape index: {0}]   ;;  %s379_s5 = inlined_call_operand.hbm [shape: f32[1,1,8,128], index: 5, kind: output, shape index: {1}]  }
   0x1   :  { %12 = vsyncpa [#allocation4], 0 }
   0x2   :  { %13 = vsyncpa [#allocation7], 0  ;;  %s290_s18 = smov [#allocation2]   ;;  %s218_s22 = scalar_lea.hbm %s375_s1, 512 }
   0x3   :  { %s21_s19 = sshll.u32 %s290_s18, 4  ;;  %p219_p0 = scmp.ne.s32.totalorder %s375_s1, %s218_s22  ;;  %s22_s19 = int_to_ptr.vmem [resolvable:$true] %s21_s19 }
   0x4   :  { %p222_p1 = scmp.lt.u32.totalorder %s218_s22, %s375_s1 }
   0x6   :  { %p224_p2 = pnand %p222_p1, %p219_p0 }
   0x8   :  { %227 = shalt.err (!%p224_p2)
}
   0x9   :  { %s228_s27 = scalar_lea.vmem %s22_s19, 512  ;;  %p233_p4 = scmp.lt.s32.totalorder %s22_s19, %s22_s19 }
   0xa   :  { %p229_p3 = scmp.ne.s32.totalorder %s22_s19, %s228_s27  ;;  %p234_p5 = scmp.lt.s32.totalorder %s228_s27, %s228_s27 }
   0xc   :  { %p235_p6 = por %p234_p5, %p233_p4 }
   0xe   :  { %p236_p7 = pnand %p235_p6, %p229_p3 }
  0x10   :  { %239 = shalt.err (!%p236_p7)
}
  0x11   :  { %s291_s28 = smov 128   ;;  %s292_s29 = smov 8  }
  0x12   :  { %27 = dma.hbm_to_vmem [thread:$0]  %s375_s1, 512, %s22_s19, [#allocation3], %s291_s28, %s291_s28, %s292_s29  }
  0x13   :  { %284 = dma.done.wait [#allocation3], 512  }
  0x14   :  { %285 = vsyncadd [#allocation3], 4294966784  ;;  %v293_v0 = vmov 0.0|0.0   ;;  %vm294_vm0 = vmmov 0   ;;  %v295_v1 = vmov 0.0   ;;  %v296_v2 = vmov 0  }
  0x15   :  { %200 = vmatprep.subr.bf16.mxu0 %v293_v0  ;;  %197 = vmatprep.mubr.msk.f32.mxu0 %vm294_vm0, %v295_v1  ;;  %v36_v3 = vld [vmem:[#allocation2] sm:$0xff]  ;;  %v37_v4 = vld [vmem:[#allocation2 + $0x8] sm:$0xff]  ;;  %v38_v5 = vld [vmem:[#allocation2 + $0x10] sm:$0xff]  ;;  %vm41_vm1 = vcmask 261120   ;;  %v129_v13 = vlaneseq }
  0x16   :  { %217 = vset.pattern.permute.xlu0 %v296_v2  ;;  %v201_v6 = vpack.c.bf16 %v37_v4, %v36_v3  ;;  %v39_v7 = vld [vmem:[#allocation2 + $0x18] sm:$0xff]  ;;  %v35_v8 = vld [vmem:[%s374_s0] sm:$0xff] }
  0x17   :  { %v40_v9 = vmul.f32 %v35_v8, %v35_v8  ;;  %v204_v10 = vpack.c.bf16 %v39_v7, %v38_v5  ;;  %v127_v12 = vld [vmem:[%s377_s3] sm:$0xff]  ;;  %v130_v15 = vand.u32 127, %v129_v13  ;;  %s297_s3 = smov [#allocation5]  }
  0x18   :  { %202 = vmatpush3.bf16.msra.mxu0 %v201_v6  ;;  %v183_v19 = vld [vmem:[%s376_s2] ss:$0 sm:$0xff]  ;;  %s159_s11 = sshll.u32 %s297_s3, 4  ;;  %s160_s11 = int_to_ptr.vmem [resolvable:$true] %s159_s11 }
  0x19   :  { %203 = vmatprep.subr.bf16.mxu0 %v293_v0  ;;  %v42_v11 = vsel %vm41_vm1, %v40_v9, 0.0  ;;  %s240_s12 = scalar_lea.vmem %s160_s11, 128  ;;  %p245_p9 = scmp.lt.s32.totalorder %s160_s11, %s160_s11 }
  0x1a   :  { %43 = vadd.xlane.f32.xlu0 %v42_v11  ;;  %p241_p8 = scmp.ne.s32.totalorder %s160_s11, %s240_s12  ;;  %p246_p10 = scmp.lt.s32.totalorder %s240_s12, %s240_s12 }
  0x1c   :  { %205 = vmatpush3.bf16.msra.mxu0 %v204_v10  ;;  %p247_p11 = por %p246_p10, %p245_p9 }
  0x1e   :  { %p248_p12 = pnand %p247_p11, %p241_p8 }
  0x1f   :  { %198 = vmatmul.mubr.msk.f32.vlgmr.msra.gmra.mrb[0].mxu0 %vm41_vm1, %v35_v8 }
  0x30   :  { %134 = vperm.xlu0 %217, %v127_v12  }
  0xa7   :  { %v44_v14 = vpop.xlane.xlu0 %43 }
  0xa8   :  { %v45_v16 = vmul.f32 -0.5, %v44_v14 }
  0xaf   :  { %v135_v17 = vpop.permute.xlu0 %134 }
  0xb0   :  { %vm136_vm2 = vcmp.eq.s32.totalorder %v130_v15, %v135_v17 }
  0xf2   :  { %v115_v18 = vpop.f32.mrb[0].mxu0 }
  0xf3   :  { %v116_v20 = vadd.f32 %v115_v18, %v45_v16  ;;  %v199_v21 = vpop.f32.mrb[1].mxu0 }
  0xf5   :  { %v126_v22 = vadd.f32 %v183_v19, %v116_v20 }
  0xf7   :  { %v137_v23 = vsel %vm136_vm2, %v126_v22, 0.0 }
  0xf8   :  { %141 = vadd.xlane.f32.xlu1 %v137_v23  ;;  %v138_v24 = vmul.f32 0.1, %v137_v23 }
  0xfa   :  { %v139_v25 = vadd.f32 %v138_v24, %v126_v22 }
  0xfc   :  { %140 = vst [vmem:[#allocation5] sm:$0xff] %v139_v25 }
  0xfd   :  { %251 = shalt.err (!%p248_p12)
}
  0xfe   :  { %s252_s14 = scalar_lea.hbm %s378_s4, 128 }
  0xff   :  { %p253_p13 = scmp.ne.s32.totalorder %s378_s4, %s252_s14  ;;  %p256_p0 = scmp.lt.u32.totalorder %s252_s14, %s378_s4 }
 0x101   :  { %p258_p1 = pnand %p256_p0, %p253_p13 }
 0x103   :  { %261 = shalt.err (!%p258_p1)
}
 0x104   :  { %162 = dma.vmem_to_hbm [thread:$0]  %s160_s11, 128, %s378_s4, [#allocation4]  }
 0x105   :  { %s298_s21 = smov [#allocation6]  }
 0x106   :  { %s169_s22 = sshll.u32 %s298_s21, 4  ;;  %s170_s22 = int_to_ptr.vmem [resolvable:$true] %s169_s22 }
 0x107   :  { %s262_s25 = scalar_lea.vmem %s170_s22, 128  ;;  %p267_p3 = scmp.lt.s32.totalorder %s170_s22, %s170_s22 }
 0x108   :  { %p263_p2 = scmp.ne.s32.totalorder %s170_s22, %s262_s25  ;;  %p268_p4 = scmp.lt.s32.totalorder %s262_s25, %s262_s25 }
 0x10a   :  { %p269_p5 = por %p268_p4, %p267_p3 }
 0x10c   :  { %p270_p6 = pnand %p269_p5, %p263_p2 }
 0x185   :  { %v142_v26 = vpop.xlane.xlu1 %141 }
 0x186   :  { %v143_v27 = vrot.slane %v142_v26, 4 }
 0x188   :  { %v144_v28 = vadd.f32 %v143_v27, %v142_v26 }
 0x18a   :  { %v145_v29 = vrot.slane %v144_v28, 2 }
 0x18c   :  { %v146_v30 = vadd.f32 %v145_v29, %v144_v28 }
 0x18e   :  { %v147_v31 = vrot.slane %v146_v30, 1 }
 0x190   :  { %v148_v32 = vadd.f32 %v147_v31, %v146_v30 }
 0x192   :  { %206 = vpush %v148_v32 }
 0x1c3   :  { %s207_s23 = spop %206 }
 0x1c4   :  { %s150_s24 = smul.f32 -0.00125, %s207_s23 }
 0x1c6   :  { %v151_v33 = vstv %s150_s24 }
 0x1c7   :  { %152 = vst [vmem:[#allocation6] sm:$0xff] %v151_v33 }
 0x1c8   :  { %273 = shalt.err (!%p270_p6)
}
 0x1c9   :  { %s274_s27 = scalar_lea.hbm %s379_s5, 128 }
 0x1ca   :  { %p275_p7 = scmp.ne.s32.totalorder %s379_s5, %s274_s27  ;;  %p278_p8 = scmp.lt.u32.totalorder %s274_s27, %s379_s5 }
 0x1cc   :  { %p280_p9 = pnand %p278_p8, %p275_p7 }
 0x1ce   :  { %283 = shalt.err (!%p280_p9)
}
 0x1cf   :  { %172 = dma.vmem_to_hbm [thread:$0]  %s170_s22, 128, %s379_s5, [#allocation7]  }
 0x1d0   :  { %286 = dma.done.wait [#allocation4], 128  }
 0x1d1   :  { %287 = vsyncadd [#allocation4], 4294967168 }
 0x1d2   :  { %288 = dma.done.wait [#allocation7], 128  }
 0x1d3   :  { %289 = vsyncadd [#allocation7], 4294967168 }
 0x1d4   :  { %179 = vsyncpa [#allocation3], 1 }
 0x1d5   :  { %180 = vsyncpa [#allocation4], 1 }
 0x1d6   :  { %181 = vsyncpa [#allocation7], 1 }

</bundles_post_ra>
